<compile_context>
chip_gen: v7x
topology: tpu7x:2x2x1
jax: 0.10.0
libtpu: 0.0.40
codegen_flags: <defaults>
</compile_context>

<pallas_src>
import math

import jax
import jax.numpy as jnp
from jax.experimental import pallas as pl
from jax.experimental.pallas import tpu as pltpu

_INV_SQRT2 = 1.0 / math.sqrt(2.0)


def _gegelu_kernel(a_ref, b_ref, o_ref):
    # a_ref: half that goes through GELU; b_ref: linear gate. Both (tr, th).
    a = a_ref[...].astype(jnp.float32)
    b = b_ref[...].astype(jnp.float32)
    # exact erf-based GELU (matches torch.nn.GELU() default), constants folded
    g = a * (0.5 + 0.5 * jax.lax.erf(a * _INV_SQRT2))
    o_ref[...] = (g * b).astype(o_ref.dtype)


def _round_up(a, m):
    return ((a + m - 1) // m) * m


def _round_down(a, m):
    return (a // m) * m


def _vmem_budget():
    """(I/O block budget, vmem_limit_bytes) derived from the chip generation."""
    try:
        cap = int(pltpu.get_tpu_info().vmem_capacity_bytes)
    except Exception:
        cap = 64 << 20  # conservative if the query is unavailable
    if cap <= (64 << 20):          # v7x-class: 64 MiB physical VMEM
        return 16 << 20, 40 << 20
    return 24 << 20, 48 << 20      # v5e / v6e: 128 MiB physical VMEM


def _block_bytes(tr, th, itemsize):
    # 2 inputs + 1 output, double-buffered (= 6 native-dtype blocks), plus
    # ~3 full-block f32 temporaries from the in-kernel upcast / erf chain.
    return 6 * tr * th * itemsize + 3 * tr * th * 4


def gegelu(x, *, vmem_limit_bytes=None):
    """GeGELU: GELU(x[..., :c//2]) * x[..., c//2:] via a Pallas TPU kernel."""
    orig_shape = x.shape
    c = orig_shape[-1]
    assert c % 2 == 0, "last dim must be even for GeGELU"
    h = c // 2
    rows = math.prod(orig_shape[:-1])  # static Python int
    x2d = x.reshape(rows, c)
    dtype = x.dtype
    itemsize = jnp.dtype(dtype).itemsize
    # sublane packing: 8 rows (f32), 16 (bf16), 32 (int8/fp8)
    sub = max(8, 32 // itemsize)

    budget, auto_vmem_limit = _vmem_budget()
    if vmem_limit_bytes is None:
        vmem_limit_bytes = auto_vmem_limit

    aligned = (h % 128) == 0
    per_elem_bytes = 6 * itemsize + 12  # matches _block_bytes per tr*th element

    # ---- channel tile: as large as the budget allows (prefer th over tr) ----
    if h <= 128:
        th = h  # equal to full array dim: always a legal block
    elif aligned:
        # zero-copy offset trick requires th | h; the largest such divisor is
        # usually h itself.
        th = 128
        for cand in range(h, 127, -128):
            if h % cand == 0 and _block_bytes(sub, cand, itemsize) <= budget:
                th = cand
                break
    else:
        th_cap = max(128, _round_down(budget // (sub * per_elem_bytes), 128))
        th = max(128, min(_round_down(h, 128), th_cap))

    # ---- row tile: fill the remaining budget; shrink tr, never th ----
    tr_cap = max(sub, _round_down(budget // (th * per_elem_bytes), sub))
    tr = max(sub, min(_round_up(rows, sub), tr_cap))

    n_rblk = pl.cdiv(rows, tr)
    n_cblk = (h // th) if aligned else pl.cdiv(h, th)

    # v7x has 2 TensorCores: make sure a "parallel" axis has >= 2 blocks when
    # there is enough work to split (no-op cost elsewhere: one extra grid step).
    if n_rblk * n_cblk == 1 and rows > sub:
        tr = max(sub, _round_up((rows + 1) // 2, sub))
        n_rblk = pl.cdiv(rows, tr)

    cost = pl.CostEstimate(
        flops=10 * rows * h,
        transcendentals=rows * h,
        bytes_accessed=3 * rows * h * itemsize,
    )
    cparams = pltpu.CompilerParams(
        dimension_semantics=("parallel", "parallel"),
        vmem_limit_bytes=vmem_limit_bytes,
    )
    out_shape = jax.ShapeDtypeStruct((rows, h), dtype)
    out_spec = pl.BlockSpec((tr, th), lambda i, j: (i, j))

    if aligned:
        # Zero-copy: pass x twice; the gate half is addressed by a block-index
        # offset of n_cblk (= h elements) along the channel axis.
        in_specs = [
            pl.BlockSpec((tr, th), lambda i, j: (i, j)),
            pl.BlockSpec((tr, th), lambda i, j, n=n_cblk: (i, j + n)),
        ]
        operands = (x2d, x2d)
    else:
        # Wrapper-side contiguous split (one XLA copy) so both halves start at
        # lane offset 0; ragged last channel block handled by the pipeline.
        in_specs = [
            pl.BlockSpec((tr, th), lambda i, j: (i, j)),
            pl.BlockSpec((tr, th), lambda i, j: (i, j)),
        ]
        operands = (x2d[:, :h], x2d[:, h:])

    out2d = pl.pallas_call(
        _gegelu_kernel,
        out_shape=out_shape,
        grid_spec=pltpu.PrefetchScalarGridSpec(
            num_scalar_prefetch=0,
            grid=(n_rblk, n_cblk),
            in_specs=in_specs,
            out_specs=out_spec,
        ),
        compiler_params=cparams,
        cost_estimate=cost,
    )(*operands)

    return out2d.reshape(*orig_shape[:-1], h)


def gegelu_ref(x):
    c = x.shape[-1]
    h = c // 2
    return jax.nn.gelu(x[..., :h], approximate=False) * x[..., h:]


if __name__ == "__main__":
    key = jax.random.PRNGKey(0)
    k1, k2, k3, k4 = jax.random.split(key, 4)

    # 1) lane-aligned fast path: channels=256 -> two 128-wide halves
    x1 = jax.random.normal(k1, (2, 8, 256), dtype=jnp.float32)
    out1 = jax.block_until_ready(gegelu(x1))
    ref1 = gegelu_ref(x1)
    assert out1.shape == (2, 8, 128), out1.shape
    assert jnp.allclose(out1, ref1, atol=1e-5, rtol=1e-5), float(
        jnp.max(jnp.abs(out1 - ref1))
    )

    # 2) aligned, full-width channel tile + multiple row blocks (h=256)
    x2 = jax.random.normal(k2, (4, 32, 512), dtype=jnp.float32)
    out2 = jax.block_until_ready(gegelu(x2))
    ref2 = gegelu_ref(x2)
    assert out2.shape == (4, 32, 256), out2.shape
    assert jnp.allclose(out2, ref2, atol=1e-5, rtol=1e-5), float(
        jnp.max(jnp.abs(out2 - ref2))
    )

    # 3) unaligned path: channels=64 -> 32-wide halves (wrapper split)
    x3 = jax.random.normal(k3, (2, 8, 64), dtype=jnp.float32)
    out3 = jax.block_until_ready(gegelu(x3))
    ref3 = gegelu_ref(x3)
    assert out3.shape == (2, 8, 32), out3.shape
    assert jnp.allclose(out3, ref3, atol=1e-5, rtol=1e-5), float(
        jnp.max(jnp.abs(out3 - ref3))
    )

    # 4) bf16 aligned (exercises 16-row sublane packing)
    x4 = jax.random.normal(k4, (2, 16, 256), dtype=jnp.bfloat16)
    out4 = jax.block_until_ready(gegelu(x4))
    ref4 = gegelu_ref(x4)
    assert out4.shape == (2, 16, 128), out4.shape
    assert jnp.allclose(
        out4.astype(jnp.float32), ref4.astype(jnp.float32), atol=3e-2, rtol=3e-2
    ), float(jnp.max(jnp.abs(out4.astype(jnp.float32) - ref4.astype(jnp.float32))))

    print("KERNEL_OK")
</pallas_src>

<mosaic_0001>
module attributes {stable_mosaic.version = 11 : i64} {
  func.func @_gegelu_kernel(%arg0: i32, %arg1: i32, %arg2: memref<8x128xf32, #tpu.memory_space<vmem>>, %arg3: memref<8x128xf32, #tpu.memory_space<vmem>>, %arg4: memref<8x128xf32, #tpu.memory_space<vmem>>) attributes {dimension_semantics = [#tpu.dimension_semantics<parallel>, #tpu.dimension_semantics<parallel>], iteration_bounds = array<i64: 2, 1>, scalar_prefetch = 0 : i64, scratch_operands = 0 : i64, tpu.core_type = #tpu.core_type<tc>, window_params = [{transform_indices = @transform_0, window_bounds = array<i64: 8, 128>}, {transform_indices = @transform_1, window_bounds = array<i64: 8, 128>}, {transform_indices = @transform_2, window_bounds = array<i64: 8, 128>}]} {
    %c0 = arith.constant 0 : index
    %c0_0 = arith.constant 0 : index
    %0 = vector.load %arg2[%c0, %c0_0] : memref<8x128xf32, #tpu.memory_space<vmem>>, vector<8x128xf32>
    %c0_1 = arith.constant 0 : index
    %c0_2 = arith.constant 0 : index
    %1 = vector.load %arg3[%c0_1, %c0_2] : memref<8x128xf32, #tpu.memory_space<vmem>>, vector<8x128xf32>
    %cst = arith.constant 0.707106769 : f32
    %2 = vector.broadcast %cst : f32 to vector<8x128xf32>
    %3 = arith.mulf %0, %2 : vector<8x128xf32>
    %4 = math.erf %3 : vector<8x128xf32>
    %cst_3 = arith.constant 5.000000e-01 : f32
    %5 = vector.broadcast %cst_3 : f32 to vector<8x128xf32>
    %6 = arith.mulf %5, %4 : vector<8x128xf32>
    %cst_4 = arith.constant 5.000000e-01 : f32
    %7 = vector.broadcast %cst_4 : f32 to vector<8x128xf32>
    %8 = arith.addf %7, %6 : vector<8x128xf32>
    %9 = arith.mulf %0, %8 : vector<8x128xf32>
    %10 = arith.mulf %9, %1 : vector<8x128xf32>
    %c0_5 = arith.constant 0 : index
    %c0_6 = arith.constant 0 : index
    %11 = vector.load %arg4[%c0_5, %c0_6] : memref<8x128xf32, #tpu.memory_space<vmem>>, vector<8x128xf32>
    tpu.vector_store %arg4[%c0_5, %c0_6], %10 {strides = array<i32>} : memref<8x128xf32, #tpu.memory_space<vmem>>, vector<8x128xf32>,
    return
  }
  func.func @transform_0(%arg0: i32, %arg1: i32) -> (i32, i32) {
    %c0_i32 = arith.constant 0 : i32
    return %arg0, %arg1 : i32, i32
  }
  func.func @transform_1(%arg0: i32, %arg1: i32) -> (i32, i32) {
    %c1_i32 = arith.constant 1 : i32
    %0 = arith.addi %arg1, %c1_i32 : i32
    %c0_i32 = arith.constant 0 : i32
    return %arg0, %0 : i32, i32
  }
  func.func @transform_2(%arg0: i32, %arg1: i32) -> (i32, i32) {
    %c0_i32 = arith.constant 0 : i32
    return %arg0, %arg1 : i32, i32
  }
}

</mosaic_0001>

<bundles_post_ra>
// kernel: tpu_custom_call.1
= control target key start
LH: loop header
LB: loop body
LE: loop exit
PB: predicated region body
PF: predicated region fallthrough
CT: control target
= control target key end

     0   :  { %7 = vsyncpa [#allocation3], 0  ;;  %s828_s0 = inlined_call_operand.hbm [shape: f32[16,256], index: 0, kind: input, shape index: {}]   ;;  %s829_s1 = inlined_call_operand.hbm [shape: f32[16,256], index: 1, kind: input, shape index: {}]   ;;  %s830_s2 = inlined_call_operand.hbm [shape: f32[16,128], index: 2, kind: output, shape index: {}]  }
   0x1   :  { %9 = vsyncpa [#allocation3 + $0x1], 0 }
   0x2   :  { %10 = vsyncpa [#allocation6], 0 }
   0x3   :  { %12 = vsyncpa [#allocation6 + $0x1], 0 }
   0x4   :  { %13 = vsyncpa [#allocation4], 0 }
   0x5   :  { %15 = vsyncpa [#allocation4 + $0x1], 0  ;;  %s609_s9 = smov 0   ;;  %s611_s10 = smov 0  }
   0x6   :  { %s613_s11 = smov 0   ;;  %s615_s12 = smov 0  }
   0x7   :  { %s617_s13 = smov 0   ;;  %s619_s14 = smov 0  }
   0x8 LB: > { %s353_s15 = sadd.s32 4294967295, %s589_s14   ;;  %s354_s16 = sadd.s32 4294967294, %s589_s14   ;;  %s589_s14 = sphi %s619_s14, %s21_s14   ;;  %s585_s13 = sphi %s617_s13, %s850_s13   ;;  %s581_s12 = sphi %s615_s12, %s849_s12   ;;  %s577_s11 = sphi %s613_s11, %s848_s11   ;;  %s573_s10 = sphi %s611_s10, %s847_s10   ;;  %s569_s9 = sphi %s609_s9, %s846_s9  }
   0x9   : > { %s33_s17 = sadd.s32 1, %s585_s13  ;;  %s42_s18 = sadd.s32 1, %s577_s11 }
   0xa   : > { %p35_p0 = scmp.ge.s32.totalorder %s33_s17, 2  ;;  %p49_p1 = scmp.ne.s32.totalorder %s577_s11, %s573_s10 }
   0xb   : > { %p50_p2 = scmp.eq.s32.totalorder %s589_s14, 0  ;;  %p55_p3 = scmp.ne.s32.totalorder %s573_s10, %s569_s9 }
   0xc   : > { %s852_s17 = smov (%p35_p0, %s33_s17), 0  ;;  %p56_p5 = scmp.eq.s32.totalorder %s353_s15, 0 }
   0xd   : > { %p650_p4 = por %p50_p2, %p49_p1  ;;  %s37_s20 = ssub.s32 %s585_s13, %s852_s17 }
   0xe   : > { %p111_p6 = scmp.eq.s32.totalorder %s353_s15, 1  ;;  %p40_p7 = scmp.eq.s32.totalorder %s37_s20, 0 }
   0xf   : > { %p656_p8 = por %p56_p5, %p55_p3  ;;  %p117_p10 = scmp.eq.s32.totalorder %s354_s16, 1 }
  0x10   : > { %p660_p9 = por %p111_p6, %p49_p1  ;;  %p390_p13 = scmp.lt.s32.totalorder %s589_s14, 2 }
  0x11   : > { %s834_s21 = scalar_select %p656_p8, 1, 0 }
  0x12   : > { %s835_s22 = scalar_select %p660_p9, 1, 0 }
  0x13   : > { %s665_s23 = scalar_select %p40_p7, %s577_s11, %s42_s18  }
  0x14   : > { %p667_p11 = por %p117_p10, %p55_p3  ;;  %s674_s25 = sand.u32 1, %s577_s11  }
  0x15   : > { %s357_s26 = sshll.u32 %s674_s25, 3  ;;  %s371_s27 = sshll.u32 %s585_s13, 8 }
  0x16   : > { %s836_s24 = scalar_select %p667_p11, 1, 0 }
  0x17   : > { %s683_s30 = scalar_lea.hbm %s828_s0, %s371_s27  ;;  %s141_s3 = scalar_lea.vmem [#allocation2], %s357_s26 }
  0x18   : > { %s150_s4 = sshll.u32 %s141_s3, 4  ;;  %p691_p0 = pnand %p390_p13, %p650_p4  ;;  %s687_s4 = int_to_ptr.vmem [resolvable:$true] %s150_s4 }
  0x19   : > { %s138_s6 = scalar_lea.sflag [#allocation3], %s674_s25  ;;  %s442_s7 = scalar_lea.hbm %s683_s30, 128 }
  0x1a   : > { %p443_p3 = scmp.ne.s32.totalorder %s683_s30, %s442_s7  ;;  %p444_p5 = pneg %p691_p0 }
  0x1b   : > { %s447_s16 = scalar_lea.hbm %s828_s0, 512  ;;  %p448_p4 = scmp.lt.u32.totalorder %s683_s30, %s828_s0 }
  0x1c   : > { %p445_p6 = pnand %p444_p5, %p443_p3  ;;  %p449_p10 = scmp.lt.u32.totalorder %s447_s16, %s442_s7 }
  0x1d   : > { %p451_p12 = scmp.lt.u32.totalorder %s442_s7, %s683_s30 }
  0x1e   : > { %p446_p7 = pneg %p445_p6  ;;  %p450_p13 = por %p449_p10, %p448_p4 }
  0x20   : > { %p452_p1 = por %p451_p12, %p450_p13 }
  0x22   : > { %p453_p2 = pnand %p452_p1, %p446_p7 }
  0x24   : > { %456 = shalt.err (!%p453_p2)
}
  0x25   : > { %s457_s20 = scalar_lea.vmem %s687_s4, 128  ;;  %s591_s28 = smov [#allocation2]  }
  0x26   : > { %p458_p3 = scmp.ne.s32.totalorder %s687_s4, %s457_s20  ;;  %s462_s29 = sshll.u32 %s591_s28, 4  ;;  %s463_s29 = int_to_ptr.vmem [resolvable:$false] %s462_s29 }
  0x27   : > { %s464_s3 = scalar_lea.vmem %s463_s29, 256  ;;  %p465_p9 = scmp.lt.s32.totalorder %s687_s4, %s463_s29 }
  0x28   : > { %p460_p6 = pnand %p458_p3, %p444_p5  ;;  %p466_p4 = scmp.lt.s32.totalorder %s464_s3, %s457_s20 }
  0x2a   : > { %p461_p11 = pneg %p460_p6  ;;  %p467_p10 = por %p466_p4, %p465_p9 }
  0x2c   : > { %p468_p12 = pnand %p467_p10, %p461_p11 }
  0x2e   : > { %471 = shalt.err (!%p468_p12)
}
  0x2f   : > { %382 = dma.hbm_to_vmem [thread:$0]  (!%p691_p0), %s683_s30, 128, %s687_s4, %s138_s6  }
  0x30   : > { %p838_p1 = scmp.lt.s32.totalorder %s589_s14, 3  ;;  %p839_p2 = scmp.ge.s32.totalorder %s589_s14, 1 }
  0x31   : > { %s286_s16 = scalar_lea.hbm %s829_s1, %s371_s27  ;;  %s161_s18 = scalar_lea.vmem [#allocation5], %s357_s26 }
  0x32   : > { %p727_p7 = pnand %p839_p2, %p838_p1  ;;  %s171_s19 = sshll.u32 %s161_s18, 4  ;;  %s172_s19 = int_to_ptr.vmem [resolvable:$true] %s171_s19 }
  0x33   : > { %s738_s20 = scalar_lea.hbm %s286_s16, 128  ;;  %s158_s30 = scalar_lea.sflag [#allocation6], %s674_s25 }
  0x34   : > { %s840_s7 = scalar_select %p727_p7, 1, 0 }
  0x35   : > { %s502_s4 = scalar_lea.hbm %s286_s16, 256  ;;  %s477_s27 = scalar_lea.hbm %s829_s1, 512 }
  0x36   : > { %p473_p9 = scmp.ne.s32.totalorder %s738_s20, %s502_s4  ;;  %p478_p3 = scmp.lt.u32.totalorder %s738_s20, %s829_s1 }
  0x37   : > { %p479_p6 = scmp.lt.u32.totalorder %s477_s27, %s502_s4  ;;  %p481_p10 = scmp.lt.u32.totalorder %s502_s4, %s738_s20 }
  0x38   : > { %p475_p11 = pnand %p473_p9, %p444_p5 }
  0x39   : > { %p480_p4 = por %p479_p6, %p478_p3 }
  0x3a   : > { %p476_p13 = pneg %p475_p11 }
  0x3b   : > { %p482_p12 = por %p481_p10, %p480_p4 }
  0x3d   : > { %p483_p1 = pnand %p482_p12, %p476_p13 }
  0x3f   : > { %486 = shalt.err (!%p483_p1)
}
  0x40   : > { %s487_s25 = scalar_lea.vmem %s172_s19, 128  ;;  %s592_s3 = smov [#allocation5]  }
  0x41   : > { %p488_p2 = scmp.ne.s32.totalorder %s172_s19, %s487_s25  ;;  %s492_s8 = sshll.u32 %s592_s3, 4  ;;  %s493_s8 = int_to_ptr.vmem [resolvable:$false] %s492_s8 }
  0x42   : > { %s494_s15 = scalar_lea.vmem %s493_s8, 256  ;;  %p495_p8 = scmp.lt.s32.totalorder %s172_s19, %s493_s8 }
  0x43   : > { %p490_p9 = pnand %p488_p2, %p444_p5  ;;  %p496_p7 = scmp.lt.s32.totalorder %s494_s15, %s487_s25 }
  0x45   : > { %p491_p11 = pneg %p490_p9  ;;  %p497_p3 = por %p496_p7, %p495_p8 }
  0x47   : > { %p498_p6 = pnand %p497_p3, %p491_p11 }
  0x49   : > { %501 = shalt.err (!%p498_p6)
}
  0x4a   : > { %385 = dma.hbm_to_vmem [thread:$0]  (!%p691_p0), %s738_s20, 128, %s172_s19, %s158_s30  }
  0x4b   : > { %p841_p13 = scmp.ne.s32.totalorder %s840_s7, 0 }
  0x4c   : > { %s762_s16 = sand.u32 (!%p841_p13), 1, %s573_s10   ;;  %p842_p5 = scmp.ne.s32.totalorder (!%p841_p13), %s834_s21, 0 }
  0x4d   : > { %180 = sbr.rel (%p841_p13) target bundleno = 123 (0x7b), region = 28  ;;  %s364_s18 = sshll.u32 (!%p841_p13), %s762_s16, 3 }
  0x4e   : > { %s183_s4 = scalar_lea.sflag (!%p841_p13), [#allocation3], %s762_s16  ;;  %s186_s6 = scalar_lea.vmem (!%p841_p13), [#allocation2], %s364_s18 }
  0x54   : > { %556 = dma.done.wait (%p842_p5), %s183_s4, 128  }
  0x55   : > { %558 = vsyncadd (%p842_p5), %s183_s4, 4294967168  ;;  %s192_s5 = scalar_lea.sflag [#allocation6], %s762_s16  ;;  %s195_s19 = scalar_lea.vmem [#allocation5], %s364_s18 }
  0x56   : > { %560 = dma.done.wait (%p842_p5), %s192_s5, 128  }
  0x57   : > { %562 = vsyncadd (%p842_p5), %s192_s5, 4294967168  ;;  %v222_v0 = vld [vmem:[%s186_s6] sm:$0xff]  ;;  %v223_v5 = vld [vmem:[%s195_s19] sm:$0xff]  ;;  %s220_s7 = scalar_lea.vmem [#allocation7], %s364_s18  ;;  %s368_s30 = sshll.u32 %s581_s12, 7 }
  0x58   : > { %v224_v1 = vmul.f32 0.70710677, %v222_v0  ;;  %s246_s20 = sshll.u32 %s220_s7, 4  ;;  %s781_s27 = scalar_lea.hbm %s830_s2, %s368_s30  ;;  %s776_s20 = int_to_ptr.vmem [resolvable:$true] %s246_s20 }
  0x59   : > { %s232_s29 = scalar_lea.sflag [#allocation4], %s762_s16  ;;  %s503_s26 = scalar_lea.vmem %s776_s20, 128 }
  0x5a   : > { %440 = verf.f32 %v224_v1  ;;  %p504_p8 = scmp.ne.s32.totalorder %s776_s20, %s503_s26  ;;  %p843_p0 = scmp.ne.s32.totalorder %s835_s22, 0 }
  0x5b   : > { %s593_s12 = smov [#allocation7]  }
  0x5c   : > { %p505_p7 = pnand %p504_p8, %p843_p0  ;;  %s507_s25 = sshll.u32 %s593_s12, 4  ;;  %s508_s25 = int_to_ptr.vmem [resolvable:$false] %s507_s25 }
  0x5d   : > { %s509_s3 = scalar_lea.vmem %s508_s25, 256  ;;  %p510_p10 = scmp.lt.s32.totalorder %s776_s20, %s508_s25 }
  0x5e   : > { %p506_p4 = pneg %p505_p7  ;;  %p511_p12 = scmp.lt.s32.totalorder %s509_s3, %s503_s26 }
  0x60   : > { %p512_p1 = por %p511_p12, %p510_p10 }
  0x62   : > { %p513_p2 = pnand %p512_p1, %p506_p4 }
  0x64   : > { %v441_v2 = vpop.eup %440 }
  0x65   : > { %v226_v3 = vmul.f32 0.5, %v441_v2 }
  0x67   : > { %v227_v4 = vadd.f32 0.5, %v226_v3 }
  0x69   : > { %v228_v6 = vmul.f32 %v227_v4, %v222_v0 }
  0x6b   : > { %v229_v7 = vmul.f32 %v228_v6, %v223_v5 }
  0x6d   : > { %230 = vst [vmem:[%s220_s7] sm:$0xff] %v229_v7 }
  0x6e   : > { %516 = shalt.err (!%p513_p2)
}
  0x6f   : > { %s517_s8 = scalar_lea.hbm %s781_s27, 128  ;;  %s521_s18 = scalar_lea.hbm %s830_s2, 256 }
  0x70   : > { %p518_p9 = scmp.ne.s32.totalorder %s781_s27, %s517_s8  ;;  %p522_p6 = scmp.lt.u32.totalorder %s781_s27, %s830_s2 }
  0x71   : > { %p523_p13 = scmp.lt.u32.totalorder %s521_s18, %s517_s8  ;;  %p525_p8 = scmp.lt.u32.totalorder %s517_s8, %s781_s27 }
  0x72   : > { %p519_p11 = pnand %p518_p9, %p843_p0 }
  0x73   : > { %p524_p5 = por %p523_p13, %p522_p6 }
  0x74   : > { %p520_p3 = pneg %p519_p11 }
  0x75   : > { %p526_p7 = por %p525_p8, %p524_p5 }
  0x77   : > { %p527_p4 = pnand %p526_p7, %p520_p3 }
  0x79   : > { %530 = shalt.err (!%p527_p4)
}
  0x7a   : > { %377 = dma.vmem_to_hbm [thread:$0]  (%p843_p0), %s776_s20, 128, %s781_s27, %s232_s29  }
  0x7b PF: > { %s258_s5 = sand.u32 1, %s569_s9   ;;  %p844_p10 = scmp.ne.s32.totalorder %s836_s24, 0 }
  0x7c   : > { %p845_p12 = scmp.ge.s32.totalorder %s589_s14, 2  ;;  %s259_s19 = scalar_lea.sflag [#allocation4], %s258_s5 }
  0x7e   : > { %p387_p1 = pnand %p845_p12, %p844_p10 }
  0x80   : > { %564 = dma.done.wait (!%p387_p1), %s259_s19, 128  }
  0x81   : > { %566 = vsyncadd (!%p387_p1), %s259_s19, 4294967168  ;;  %s21_s14 = sadd.s32 1, %s589_s14   ;;  %s846_s9 = smov %s573_s10 }
  0x82   : > { %p18_p2 = scmp.ge.s32.totalorder %s21_s14, 4   ;;  %s847_s10 = smov %s577_s11 }
  0x83   : > { %s848_s11 = smov %s665_s23  ;;  %s849_s12 = smov %s585_s13 }
  0x84   : > { %s850_s13 = smov %s852_s17  ;;  %20 = sbr.rel (!%p18_p2) target bundleno = 8 (0x8), region = 86 }
  0x8b   :  { %264 = vsyncpa [#allocation3], 1 }
  0x8c   :  { %266 = vsyncpa [#allocation3 + $0x1], 1 }
  0x8d   :  { %267 = vsyncpa [#allocation6], 1 }
  0x8e   :  { %269 = vsyncpa [#allocation6 + $0x1], 1 }
  0x8f   :  { %270 = vsyncpa [#allocation4], 1 }
  0x90   :  { %272 = vsyncpa [#allocation4 + $0x1], 1 }

</bundles_post_ra>
